<compile_context>
chip_gen: v7x
topology: tpu7x:2x2x1
jax: 0.10.0
libtpu: 0.0.40
codegen_flags: <defaults>
</compile_context>

<pallas_src>
import functools
import math

import jax
import jax.numpy as jnp
from jax import lax
from jax.experimental import pallas as pl
from jax.experimental.pallas import tpu as pltpu


def _round_up(x: int, m: int) -> int:
    return (x + m - 1) // m * m


def _largest_aligned_divisor(n: int, upper: int, align: int = 128) -> int:
    """Largest multiple of `align` that divides n and is <= upper (n % align == 0)."""
    best = align
    d = align
    lim = min(n, upper)
    while d <= lim:
        if n % d == 0:
            best = d
        d += align
    return best


@functools.lru_cache(maxsize=1)
def _device_info():
    """(device_kind lowercased, per-core VMEM capacity bytes)."""
    kind = ""
    try:
        kind = jax.devices()[0].device_kind.lower()
    except Exception:
        pass
    vmem = None
    try:
        vmem = int(pltpu.get_tpu_info().vmem_capacity_bytes)
    except Exception:
        pass
    if not vmem or vmem <= 0:
        # Conservative fallback: 64 MiB (v7x per-core); 128 MiB on v5e/v6e.
        vmem = 128 * 2**20 if ("v5" in kind or "v6" in kind) else 64 * 2**20
    return kind, vmem


def _is_v7(kind: str) -> bool:
    return ("v7" in kind) or ("tpu7" in kind) or ("7x" in kind)


def _default_tm(kind: str) -> int:
    # Arithmetic intensity of the streaming loop ~ tm flops/byte (bf16 weights).
    if "v5" in kind:
        return 256          # v5e already sits near its ~240 flop/byte ridge
    if "v6" in kind:
        return 768          # v6e ridge ~650 flop/byte
    return 512              # v7x (or unknown): ridge ~310 flop/byte


_Buffered = getattr(pl, "Buffered", None)


def _block_spec(shape, index_map, *, single_buffer=False):
    """BlockSpec; optionally single-buffered (grid-invariant blocks, v7x VMEM relief)."""
    if single_buffer and _Buffered is not None:
        try:
            return pl.BlockSpec(shape, index_map, pipeline_mode=_Buffered(1))
        except (TypeError, ValueError):
            pass
    return pl.BlockSpec(shape, index_map)


# ----------------------------------------------------------------------------
# Kernels
# ----------------------------------------------------------------------------
def _ffn_resident_kernel(x_ref, w1_ref, b1_ref, w2_ref, b2_ref, o_ref):
    # x (tm, Dp); w1 (Fp, Dp); b1 (1, Fp); w2 (Fp, Dp); b2 (1, Dp); o (tm, Dp)
    h = lax.dot_general(x_ref[...], w1_ref[...],
                        dimension_numbers=(((1,), (1,)), ((), ())),
                        preferred_element_type=jnp.float32)
    h = jnp.maximum(h + b1_ref[...].astype(jnp.float32), 0.0)       # bias then ReLU
    # dropout = identity (eval mode)
    out = jnp.dot(h.astype(w2_ref.dtype), w2_ref[...],
                  preferred_element_type=jnp.float32)
    o_ref[...] = (out + b2_ref[...].astype(jnp.float32)).astype(o_ref.dtype)


def _ffn_reduce_kernel(x_ref, w1_ref, b1_ref, w2_ref, b2_ref, o_ref, *scratch,
                       acc_in_out):
    # Grid: (row tiles, d_ffn chunks); k is the reduction axis (last, "arbitrary").
    k = pl.program_id(1)
    acc_ref = o_ref if acc_in_out else scratch[0]

    @pl.when(k == 0)
    def _init():
        acc_ref[...] = jnp.zeros_like(acc_ref)

    h = lax.dot_general(x_ref[...], w1_ref[...],
                        dimension_numbers=(((1,), (1,)), ((), ())),
                        preferred_element_type=jnp.float32)
    h = jnp.maximum(h + b1_ref[...].astype(jnp.float32), 0.0)       # per-chunk, exact
    # dropout = identity (eval mode)
    acc_ref[...] += jnp.dot(h.astype(w2_ref.dtype), w2_ref[...],
                            preferred_element_type=jnp.float32)

    @pl.when(k == pl.num_programs(1) - 1)
    def _finalize():
        out = acc_ref[...].astype(jnp.float32) + b2_ref[...].astype(jnp.float32)
        o_ref[...] = out.astype(o_ref.dtype)


# ----------------------------------------------------------------------------
# Wrapper
# ----------------------------------------------------------------------------
@functools.partial(jax.jit, static_argnames=("tm", "tf", "weights_resident"))
def position_wise_feed_forward(x, w1, b1, w2, b2, *, tm=None, tf=2048,
                               weights_resident=None):
    """Fused FFN forward: relu(x @ w1.T + b1) @ w2 + b2 (eval mode).

    x: (B, S, d_model); w1: (d_ffn, d_model) [torch linear_1.weight layout];
    b1: (d_ffn,); w2: (d_ffn, d_model) [torch linear_2.weight.T]; b2: (d_model,).
    tm: row tile (None -> generation-aware default).  tf: d_ffn tile for the
    streaming-reduction path.  weights_resident: None=auto, True/False=force.
    """
    B, S, d_model = x.shape
    F_w, D_w = w1.shape
    assert w2.shape == (F_w, D_w) and D_w >= d_model
    assert b1.size == F_w and b2.size == D_w
    M = B * S
    out_dtype = x.dtype

    kind, vmem_cap = _device_info()
    is_v7 = _is_v7(kind)
    budget = max(24 * 2**20, int(0.70 * vmem_cap))     # VMEM we plan to use
    ceiling = max(32 * 2**20, int(0.85 * vmem_cap))    # scoped-VMEM hard cap

    # --- pad weights only if not lane-aligned; prefer prepare_weights() once
    # at init so this block is a no-op per call and only x is padded here. ----
    Dp = _round_up(D_w, 128)
    Fp = _round_up(F_w, 128)
    if (Fp, Dp) != (F_w, D_w):
        w1 = jnp.pad(w1, ((0, Fp - F_w), (0, Dp - D_w)))
        w2 = jnp.pad(w2, ((0, Fp - F_w), (0, Dp - D_w)))
        b1 = jnp.pad(b1.reshape(-1), ((0, Fp - F_w),))
        b2 = jnp.pad(b2.reshape(-1), ((0, Dp - D_w),))
    b1 = b1.reshape(1, Fp)
    b2 = b2.reshape(1, Dp)

    w_isz = jnp.dtype(w1.dtype).itemsize
    x_isz = jnp.dtype(x.dtype).itemsize
    o_isz = jnp.dtype(out_dtype).itemsize
    weight_bytes = 2 * Fp * Dp * w_isz + (Fp + Dp) * w_isz

    # --- row tile: generation-aware default, clamped to the problem ----------
    tm_base = tm if tm is not None else _default_tm(kind)
    tm_eff = max(16, min(_round_up(tm_base, 16), _round_up(M, 16)))

    single_buf = is_v7 and (_Buffered is not None)     # single-buffer invariant blocks
    wmul = 1 if single_buf else 2

    def resident_ws(tm_):
        return (wmul * weight_bytes
                + 2 * tm_ * Dp * (x_isz + o_isz)        # x / out tiles (double-buf)
                + tm_ * Fp * (4 + w_isz))               # f32 h + downcast copy

    def reduce_ws(tm_, tf_, with_acc):
        return (2 * (tm_ * Dp * x_isz                   # x tile
                     + 2 * tf_ * Dp * w_isz             # w1 + w2 chunks
                     + tf_ * w_isz + Dp * w_isz)        # b1 chunk + b2
                + 2 * tm_ * Dp * o_isz                  # out tile
                + (tm_ * Dp * 4 if with_acc else 0)     # f32 accumulator scratch
                + tm_ * tf_ * (4 + w_isz))              # f32 h + downcast copy

    # --- path selection: weights-resident if it fits the VMEM budget ---------
    tm_res = tm_eff
    while tm_res > 128 and resident_ws(tm_res) > budget:
        tm_res = max(128, _round_up(tm_res // 2, 16))
    resident_fits = resident_ws(tm_res) <= budget
    use_resident = resident_fits if weights_resident is None else bool(weights_resident)
    if use_resident and resident_fits:
        tm_eff = tm_res

    # v7x megacore: make sure both TensorCores get at least one row tile.
    if is_v7:
        while tm_eff > 128 and _round_up(M, tm_eff) // tm_eff < 2:
            tm_eff = max(128, _round_up(tm_eff // 2, 16))

    Mp = _round_up(M, tm_eff)
    x2d = jnp.pad(x.reshape(M, d_model), ((0, Mp - M), (0, Dp - d_model)))
    flops = 4 * Mp * Dp * Fp

    if use_resident:
        # ------- weights-resident fast path: weights DMA'd once -------------
        grid = (Mp // tm_eff,)
        ws = resident_ws(tm_eff)
        vmem_limit = int(min(ceiling, max(32 * 2**20, int(1.3 * ws) + (2 << 20))))
        cost = pl.CostEstimate(
            flops=flops, transcendentals=0,
            bytes_accessed=int(x2d.size * x_isz + Mp * Dp * o_isz + weight_bytes))
        in_specs = [
            pl.BlockSpec((tm_eff, Dp), lambda i: (i, 0)),                       # x
            _block_spec((Fp, Dp), lambda i: (0, 0), single_buffer=single_buf),  # w1
            _block_spec((1, Fp), lambda i: (0, 0), single_buffer=single_buf),   # b1
            _block_spec((Fp, Dp), lambda i: (0, 0), single_buffer=single_buf),  # w2
            _block_spec((1, Dp), lambda i: (0, 0), single_buffer=single_buf),   # b2
        ]
        out2d = pl.pallas_call(
            _ffn_resident_kernel,
            out_shape=jax.ShapeDtypeStruct((Mp, Dp), out_dtype),
            grid_spec=pltpu.PrefetchScalarGridSpec(
                num_scalar_prefetch=0, grid=grid,
                in_specs=in_specs,
                out_specs=pl.BlockSpec((tm_eff, Dp), lambda i: (i, 0)),
                scratch_shapes=()),
            compiler_params=pltpu.CompilerParams(
                dimension_semantics=("parallel",),
                vmem_limit_bytes=vmem_limit),
            cost_estimate=cost,
        )(x2d, w1, b1, w2, b2)
    else:
        # ------- streaming reduction over d_ffn chunks -----------------------
        tf_eff = _largest_aligned_divisor(Fp, max(128, min(tf, Fp)))
        nk = Fp // tf_eff
        acc_in_out = (out_dtype == jnp.float32)   # accumulate directly in o_ref
        ws = reduce_ws(tm_eff, tf_eff, not acc_in_out)
        vmem_limit = int(min(ceiling, max(32 * 2**20, int(1.3 * ws) + (2 << 20))))
        row_tiles = Mp // tm_eff
        cost = pl.CostEstimate(
            flops=flops, transcendentals=0,
            bytes_accessed=int(x2d.size * x_isz + Mp * Dp * o_isz
                               + row_tiles * (2 * Fp * Dp + Fp) * w_isz
                               + Dp * w_isz))
        kernel = functools.partial(_ffn_reduce_kernel, acc_in_out=acc_in_out)
        scratch = () if acc_in_out else (pltpu.VMEM((tm_eff, Dp), jnp.float32),)
        in_specs = [
            pl.BlockSpec((tm_eff, Dp), lambda i, k: (i, 0)),   # x (resident over k)
            pl.BlockSpec((tf_eff, Dp), lambda i, k: (k, 0)),   # w1 chunk (contiguous)
            pl.BlockSpec((1, tf_eff), lambda i, k: (0, k)),    # b1 chunk
            pl.BlockSpec((tf_eff, Dp), lambda i, k: (k, 0)),   # w2 chunk (contiguous)
            _block_spec((1, Dp), lambda i, k: (0, 0), single_buffer=single_buf),  # b2
        ]
        out2d = pl.pallas_call(
            kernel,
            out_shape=jax.ShapeDtypeStruct((Mp, Dp), out_dtype),
            grid_spec=pltpu.PrefetchScalarGridSpec(
                num_scalar_prefetch=0, grid=(row_tiles, nk),
                in_specs=in_specs,
                out_specs=pl.BlockSpec((tm_eff, Dp), lambda i, k: (i, 0)),
                scratch_shapes=scratch),
            compiler_params=pltpu.CompilerParams(
                dimension_semantics=("parallel", "arbitrary"),
                vmem_limit_bytes=vmem_limit),
            cost_estimate=cost,
        )(x2d, w1, b1, w2, b2)

    return out2d[:M, :d_model].reshape(B, S, d_model)


# ----------------------------------------------------------------------------
# Parameter helpers
# ----------------------------------------------------------------------------
def prepare_weights(w1, b1, w2, b2):
    """Pad weights/biases to lane-aligned shapes ONCE (at init), so the per-call
    forward does no weight padding (only x is padded per call)."""
    F, D = w1.shape
    Dp, Fp = _round_up(D, 128), _round_up(F, 128)
    w1 = jnp.pad(w1, ((0, Fp - F), (0, Dp - D)))
    w2 = jnp.pad(w2, ((0, Fp - F), (0, Dp - D)))
    b1 = jnp.pad(b1.reshape(-1), ((0, Fp - F),))
    b2 = jnp.pad(b2.reshape(-1), ((0, Dp - D),))
    return w1, b1, w2, b2


def init_params(key, d_model, d_ffn, dtype=jnp.float32):
    """nn.Linear-style init (U(+-1/sqrt(fan_in))).
    Layouts: w1 (d_ffn, d_model) == linear_1.weight; w2 (d_ffn, d_model) ==
    linear_2.weight.T; b1 (d_ffn,); b2 (d_model,)."""
    k1, k2, k3, k4 = jax.random.split(key, 4)
    lim1 = 1.0 / math.sqrt(d_model)
    lim2 = 1.0 / math.sqrt(d_ffn)
    w1 = jax.random.uniform(k1, (d_ffn, d_model), jnp.float32, -lim1, lim1)
    b1 = jax.random.uniform(k2, (d_ffn,), jnp.float32, -lim1, lim1)
    w2 = jax.random.uniform(k3, (d_ffn, d_model), jnp.float32, -lim2, lim2)
    b2 = jax.random.uniform(k4, (d_model,), jnp.float32, -lim2, lim2)
    return (w1.astype(dtype), b1.astype(dtype), w2.astype(dtype), b2.astype(dtype))


def _reference(x, w1, b1, w2, b2):
    """Plain-JAX f32 reference of the module forward (eval mode)."""
    xf, w1f, b1f, w2f, b2f = (a.astype(jnp.float32) for a in (x, w1, b1, w2, b2))
    h = jnp.maximum(jnp.dot(xf, w1f.T, precision="highest") + b1f, 0.0)
    return jnp.dot(h, w2f, precision="highest") + b2f


if __name__ == "__main__":
    key = jax.random.PRNGKey(0)

    # Test 1: small f32, auto path (weights-resident), unaligned dims (fallback pad).
    B, S, D, F = 2, 8, 32, 64
    kx, kp, key = jax.random.split(key, 3)
    x = jax.random.normal(kx, (B, S, D), jnp.float32)
    w1, b1, w2, b2 = init_params(kp, D, F)
    out = jax.block_until_ready(position_wise_feed_forward(x, w1, b1, w2, b2))
    ref = _reference(x, w1, b1, w2, b2)
    assert out.shape == (B, S, D)
    assert jnp.allclose(out, ref, atol=2e-4, rtol=2e-4)

    # Test 2: ragged f32 shapes, forced streaming-reduction path (acc in o_ref).
    B, S, D, F = 2, 100, 160, 384
    kx, kp, key = jax.random.split(key, 3)
    x = jax.random.normal(kx, (B, S, D), jnp.float32)
    w1, b1, w2, b2 = init_params(kp, D, F)
    out = jax.block_until_ready(position_wise_feed_forward(
        x, w1, b1, w2, b2, tm=128, tf=128, weights_resident=False))
    ref = _reference(x, w1, b1, w2, b2)
    assert out.shape == (B, S, D)
    assert jnp.allclose(out, ref, atol=2e-4, rtol=2e-4)

    # Test 3: bf16, pre-padded weights, forced reduction path (f32 scratch acc).
    B, S, D, F = 2, 192, 256, 1024
    kx, kp, key = jax.random.split(key, 3)
    x = jax.random.normal(kx, (B, S, D), jnp.float32).astype(jnp.bfloat16)
    w1, b1, w2, b2 = init_params(kp, D, F, dtype=jnp.bfloat16)
    w1p, b1p, w2p, b2p = prepare_weights(w1, b1, w2, b2)
    out = jax.block_until_ready(position_wise_feed_forward(
        x, w1p, b1p, w2p, b2p, tm=128, tf=256, weights_resident=False))
    ref = _reference(x, w1, b1, w2, b2)
    rel = (jnp.max(jnp.abs(out.astype(jnp.float32) - ref))
           / (jnp.max(jnp.abs(ref)) + 1e-6))
    assert out.shape == (B, S, D)
    assert rel < 5e-2, float(rel)

    # Test 4: bf16, auto (weights-resident) path.
    B, S, D, F = 2, 64, 256, 512
    kx, kp, key = jax.random.split(key, 3)
    x = jax.random.normal(kx, (B, S, D), jnp.float32).astype(jnp.bfloat16)
    w1, b1, w2, b2 = init_params(kp, D, F, dtype=jnp.bfloat16)
    out = jax.block_until_ready(position_wise_feed_forward(x, w1, b1, w2, b2))
    ref = _reference(x, w1, b1, w2, b2)
    rel = (jnp.max(jnp.abs(out.astype(jnp.float32) - ref))
           / (jnp.max(jnp.abs(ref)) + 1e-6))
    assert rel < 5e-2, float(rel)

    print("KERNEL_OK")
</pallas_src>

<mosaic_0001>
module attributes {stable_mosaic.version = 11 : i64} {
  func.func @_ffn_resident_kernel(%arg0: i32, %arg1: memref<16x128xf32, #tpu.memory_space<vmem>>, %arg2: memref<128x128xf32, #tpu.memory_space<vmem>>, %arg3: memref<1x128xf32, #tpu.memory_space<vmem>>, %arg4: memref<128x128xf32, #tpu.memory_space<vmem>>, %arg5: memref<1x128xf32, #tpu.memory_space<vmem>>, %arg6: memref<16x128xf32, #tpu.memory_space<vmem>>) attributes {dimension_semantics = [#tpu.dimension_semantics<parallel>], iteration_bounds = array<i64: 1>, scalar_prefetch = 0 : i64, scratch_operands = 0 : i64, tpu.core_type = #tpu.core_type<tc>, window_params = [{transform_indices = @transform_0, window_bounds = array<i64: 16, 128>}, {pipeline_mode = #tpu.pipeline_mode<synchronous>, transform_indices = @transform_1, window_bounds = array<i64: 128, 128>}, {pipeline_mode = #tpu.pipeline_mode<synchronous>, transform_indices = @transform_2, window_bounds = array<i64: 1, 128>}, {pipeline_mode = #tpu.pipeline_mode<synchronous>, transform_indices = @transform_3, window_bounds = array<i64: 128, 128>}, {pipeline_mode = #tpu.pipeline_mode<synchronous>, transform_indices = @transform_4, window_bounds = array<i64: 1, 128>}, {transform_indices = @transform_5, window_bounds = array<i64: 16, 128>}]} {
    %c0 = arith.constant 0 : index
    %c0_0 = arith.constant 0 : index
    %0 = vector.load %arg1[%c0, %c0_0] : memref<16x128xf32, #tpu.memory_space<vmem>>, vector<16x128xf32>
    %c0_1 = arith.constant 0 : index
    %c0_2 = arith.constant 0 : index
    %1 = vector.load %arg2[%c0_1, %c0_2] : memref<128x128xf32, #tpu.memory_space<vmem>>, vector<128x128xf32>
    %cst = arith.constant dense<0.000000e+00> : vector<16x128xf32>
    %2 = tpu.matmul %0, %1, %cst {dimension_numbers = #tpu.dot_dimension_numbers<[1], [1], [0], [0], [0, 0, 1, 0], [], []>} : vector<16x128xf32>, vector<128x128xf32>, vector<16x128xf32> -> vector<16x128xf32>
    %c0_3 = arith.constant 0 : index
    %c0_4 = arith.constant 0 : index
    %3 = vector.load %arg3[%c0_3, %c0_4] : memref<1x128xf32, #tpu.memory_space<vmem>>, vector<1x128xf32>
    %4 = vector.broadcast %3 : vector<1x128xf32> to vector<16x128xf32>
    %5 = arith.addf %2, %4 : vector<16x128xf32>
    %cst_5 = arith.constant 0.000000e+00 : f32
    %6 = vector.broadcast %cst_5 : f32 to vector<16x128xf32>
    %7 = arith.maximumf %5, %6 : vector<16x128xf32>
    %c0_6 = arith.constant 0 : index
    %c0_7 = arith.constant 0 : index
    %8 = vector.load %arg4[%c0_6, %c0_7] : memref<128x128xf32, #tpu.memory_space<vmem>>, vector<128x128xf32>
    %cst_8 = arith.constant dense<0.000000e+00> : vector<16x128xf32>
    %9 = tpu.matmul %7, %8, %cst_8 {dimension_numbers = #tpu.dot_dimension_numbers<[1], [0], [0], [1], [0, 0, 1, 1], [], []>} : vector<16x128xf32>, vector<128x128xf32>, vector<16x128xf32> -> vector<16x128xf32>
    %c0_9 = arith.constant 0 : index
    %c0_10 = arith.constant 0 : index
    %10 = vector.load %arg5[%c0_9, %c0_10] : memref<1x128xf32, #tpu.memory_space<vmem>>, vector<1x128xf32>
    %11 = vector.broadcast %10 : vector<1x128xf32> to vector<16x128xf32>
    %12 = arith.addf %9, %11 : vector<16x128xf32>
    %c0_11 = arith.constant 0 : index
    %c0_12 = arith.constant 0 : index
    %13 = vector.load %arg6[%c0_11, %c0_12] : memref<16x128xf32, #tpu.memory_space<vmem>>, vector<16x128xf32>
    tpu.vector_store %arg6[%c0_11, %c0_12], %12 {strides = array<i32>} : memref<16x128xf32, #tpu.memory_space<vmem>>, vector<16x128xf32>,
    return
  }
  func.func @transform_0(%arg0: i32) -> (i32, i32) {
    %c0_i32 = arith.constant 0 : i32
    %c0_i32_0 = arith.constant 0 : i32
    return %arg0, %c0_i32 : i32, i32
  }
  func.func @transform_1(%arg0: i32) -> (i32, i32) {
    %c0_i32 = arith.constant 0 : i32
    %c0_i32_0 = arith.constant 0 : i32
    %c0_i32_1 = arith.constant 0 : i32
    return %c0_i32, %c0_i32_0 : i32, i32
  }
  func.func @transform_2(%arg0: i32) -> (i32, i32) {
    %c0_i32 = arith.constant 0 : i32
    %c0_i32_0 = arith.constant 0 : i32
    %c0_i32_1 = arith.constant 0 : i32
    return %c0_i32, %c0_i32_0 : i32, i32
  }
  func.func @transform_3(%arg0: i32) -> (i32, i32) {
    %c0_i32 = arith.constant 0 : i32
    %c0_i32_0 = arith.constant 0 : i32
    %c0_i32_1 = arith.constant 0 : i32
    return %c0_i32, %c0_i32_0 : i32, i32
  }
  func.func @transform_4(%arg0: i32) -> (i32, i32) {
    %c0_i32 = arith.constant 0 : i32
    %c0_i32_0 = arith.constant 0 : i32
    %c0_i32_1 = arith.constant 0 : i32
    return %c0_i32, %c0_i32_0 : i32, i32
  }
  func.func @transform_5(%arg0: i32) -> (i32, i32) {
    %c0_i32 = arith.constant 0 : i32
    %c0_i32_0 = arith.constant 0 : i32
    return %arg0, %c0_i32 : i32, i32
  }
}

</mosaic_0001>

<bundles_post_ra>
// kernel: position_wise_feed_forward.1
= control target key start
LH: loop header
LB: loop body
LE: loop exit
PB: predicated region body
PF: predicated region fallthrough
CT: control target
= control target key end

     0   :  { %s542_s1 = inlined_call_operand.vmem [shape: f32[128,128], index: 1, kind: input, shape index: {}]   ;;  %s543_s0 = inlined_call_operand.vmem [shape: f32[16,128], index: 0, kind: input, shape index: {}]   ;;  %s544_s3 = inlined_call_operand.vmem [shape: f32[128,128], index: 3, kind: input, shape index: {}]   ;;  %s545_s2 = inlined_call_operand.vmem [shape: f32[1,128], index: 2, kind: input, shape index: {}]   ;;  %s546_s4 = inlined_call_operand.vmem [shape: f32[1,128], index: 4, kind: input, shape index: {}]   ;;  %s547_s5 = inlined_call_operand.vmem [shape: f32[16,128], index: 5, kind: output, shape index: {}]  }
   0x1   :  { %v22_v0 = vld [vmem:[%s542_s1] sm:$0xff]  ;;  %v23_v1 = vld [vmem:[%s542_s1 + $0x8] sm:$0xff]  ;;  %v24_v2 = vld [vmem:[%s542_s1 + $0x10] sm:$0xff] }
   0x2   :  { %v334_v3 = vpack.c.bf16 %v23_v1, %v22_v0  ;;  %v25_v4 = vld [vmem:[%s542_s1 + $0x18] sm:$0xff]  ;;  %v26_v6 = vld [vmem:[%s542_s1 + $0x20] sm:$0xff]  ;;  %v27_v7 = vld [vmem:[%s542_s1 + $0x28] sm:$0xff] }
   0x3   :  { %v338_v5 = vpack.c.bf16 %v25_v4, %v24_v2  ;;  %v20_v8 = vld [vmem:[%s543_s0] sm:$0xff]  ;;  %v123_v10 = vld [vmem:[%s544_s3 + $0x8] sm:$0xff]  ;;  %v124_v11 = vld [vmem:[%s544_s3 + $0x10] sm:$0xff]  ;;  %v342_v17 = vpack.c.bf16 %v27_v7, %v26_v6 }
   0x4   :  { %335 = vmatprep.subr.bf16.mxu0 %v334_v3  ;;  %296 = vmatprep.mubr.f32.mxu0 %v20_v8  ;;  %v122_v9 = vld [vmem:[%s544_s3] sm:$0xff]  ;;  %v125_v13 = vld [vmem:[%s544_s3 + $0x18] sm:$0xff]  ;;  %v127_v16 = vld [vmem:[%s544_s3 + $0x28] sm:$0xff] }
   0x5   :  { %337 = vmatpush3.bf16.xpose.msra.mxu0 %v334_v3  ;;  %v366_v12 = vpack.c.bf16 %v123_v10, %v122_v9  ;;  %v370_v14 = vpack.c.bf16 %v125_v13, %v124_v11  ;;  %v126_v15 = vld [vmem:[%s544_s3 + $0x20] sm:$0xff]  ;;  %v128_v19 = vld [vmem:[%s544_s3 + $0x30] sm:$0xff]  ;;  %v129_v20 = vld [vmem:[%s544_s3 + $0x38] sm:$0xff] }
   0x6   :  { %339 = vmatprep.subr.bf16.mxu0 %v338_v5  ;;  %v374_v18 = vpack.c.bf16 %v127_v16, %v126_v15  ;;  %v28_v21 = vld [vmem:[%s542_s1 + $0x30] sm:$0xff]  ;;  %v29_v22 = vld [vmem:[%s542_s1 + $0x38] sm:$0xff]  ;;  %v378_v23 = vpack.c.bf16 %v129_v20, %v128_v19  ;;  %v130_v24 = vld [vmem:[%s544_s3 + $0x40] sm:$0xff] }
   0x7   :  { %367 = vmatprep.subr.bf16.mxu1 %v366_v12  ;;  %v131_v25 = vld [vmem:[%s544_s3 + $0x48] sm:$0xff]  ;;  %v346_v26 = vpack.c.bf16 %v29_v22, %v28_v21  ;;  %v132_v28 = vld [vmem:[%s544_s3 + $0x50] sm:$0xff]  ;;  %v133_v29 = vld [vmem:[%s544_s3 + $0x58] sm:$0xff] }
   0x8   :  { %369 = vmatpush3.bf16.msra.mxu1 %v366_v12  ;;  %v382_v27 = vpack.c.bf16 %v131_v25, %v130_v24  ;;  %v30_v30 = vld [vmem:[%s542_s1 + $0x40] sm:$0xff]  ;;  %v31_v31 = vld [vmem:[%s542_s1 + $0x48] sm:$0xff]  ;;  %v386_v32 = vpack.c.bf16 %v133_v29, %v132_v28  ;;  %v32_v37 = vld [vmem:[%s542_s1 + $0x50] sm:$0xff] }
   0x9   :  { %371 = vmatprep.subr.bf16.mxu1 %v370_v14  ;;  %v134_v33 = vld [vmem:[%s544_s3 + $0x60] sm:$0xff]  ;;  %v135_v34 = vld [vmem:[%s544_s3 + $0x68] sm:$0xff]  ;;  %v350_v35 = vpack.c.bf16 %v31_v31, %v30_v30  ;;  %v33_v38 = vld [vmem:[%s542_s1 + $0x58] sm:$0xff] }
   0xa   :  { %v390_v36 = vpack.c.bf16 %v135_v34, %v134_v33  ;;  %v354_v39 = vpack.c.bf16 %v33_v38, %v32_v37  ;;  %v34_v40 = vld [vmem:[%s542_s1 + $0x60] sm:$0xff]  ;;  %v35_v41 = vld [vmem:[%s542_s1 + $0x68] sm:$0xff]  ;;  %v36_v43 = vld [vmem:[%s542_s1 + $0x70] sm:$0xff] }
   0xb   :  { %v358_v42 = vpack.c.bf16 %v35_v41, %v34_v40  ;;  %v37_v44 = vld [vmem:[%s542_s1 + $0x78] sm:$0xff]  ;;  %v21_v46 = vld [vmem:[%s543_s0 + $0x8] sm:$0xff]  ;;  %v136_v47 = vld [vmem:[%s544_s3 + $0x70] sm:$0xff] }
   0xc   :  { %373 = vmatpush3.bf16.msra.mxu1 %v370_v14  ;;  %v362_v45 = vpack.c.bf16 %v37_v44, %v36_v43  ;;  %v137_v48 = vld [vmem:[%s544_s3 + $0x78] sm:$0xff]  ;;  %v226_v50 = vld [vmem:[%s545_s2] ss:$0 sm:$0xff] }
   0xd   :  { %341 = vmatpush3.bf16.xpose.msra.mxu0 %v338_v5  ;;  %375 = vmatprep.subr.bf16.mxu1 %v374_v18  ;;  %v394_v49 = vpack.c.bf16 %v137_v48, %v136_v47  ;;  %v227_v57 = vld [vmem:[%s546_s4] ss:$0 sm:$0xff] }
   0xe   :  { %343 = vmatprep.subr.bf16.mxu0 %v342_v17 }
  0x10   :  { %377 = vmatpush3.bf16.msra.mxu1 %v374_v18 }
  0x11   :  { %379 = vmatprep.subr.bf16.mxu1 %v378_v23 }
  0x14   :  { %381 = vmatpush3.bf16.msra.mxu1 %v378_v23 }
  0x15   :  { %345 = vmatpush3.bf16.xpose.msra.mxu0 %v342_v17  ;;  %383 = vmatprep.subr.bf16.mxu1 %v382_v27 }
  0x16   :  { %347 = vmatprep.subr.bf16.mxu0 %v346_v26 }
  0x18   :  { %385 = vmatpush3.bf16.msra.mxu1 %v382_v27 }
  0x19   :  { %387 = vmatprep.subr.bf16.mxu1 %v386_v32 }
  0x1c   :  { %389 = vmatpush3.bf16.msra.mxu1 %v386_v32 }
  0x1d   :  { %349 = vmatpush3.bf16.xpose.msra.mxu0 %v346_v26  ;;  %391 = vmatprep.subr.bf16.mxu1 %v390_v36 }
  0x1e   :  { %351 = vmatprep.subr.bf16.mxu0 %v350_v35 }
  0x20   :  { %393 = vmatpush3.bf16.msra.mxu1 %v390_v36 }
  0x21   :  { %395 = vmatprep.subr.bf16.mxu1 %v394_v49 }
  0x24   :  { %397 = vmatpush3.bf16.msra.mxu1 %v394_v49 }
  0x25   :  { %353 = vmatpush3.bf16.xpose.msra.mxu0 %v350_v35 }
  0x26   :  { %355 = vmatprep.subr.bf16.mxu0 %v354_v39 }
  0x2d   :  { %357 = vmatpush3.bf16.xpose.msra.mxu0 %v354_v39 }
  0x2e   :  { %359 = vmatprep.subr.bf16.mxu0 %v358_v42 }
  0x35   :  { %361 = vmatpush3.bf16.xpose.msra.mxu0 %v358_v42 }
  0x36   :  { %363 = vmatprep.subr.bf16.mxu0 %v362_v45 }
  0x3d   :  { %365 = vmatpush3.bf16.xpose.msra.mxu0 %v362_v45 }
  0x44   :  { %297 = vmatmul.mubr.f32.vlgmr.msra.gmra.mrb[0].mxu0 %v21_v46 }
 0x117   :  { %v298_v51 = vpop.f32.mrb[0].mxu0 }
 0x118   :  { %v117_v52 = vadd.f32 %v298_v51, %v226_v50  ;;  %v111_v53 = vpop.f32.mrb[1].mxu0 }
 0x119   :  { %v112_v54 = vadd.f32 %v226_v50, %v111_v53 }
 0x11a   :  { %v121_v56 = vmax.f32 %v117_v52, 0.0 }
 0x11b   :  { %v120_v55 = vmax.f32 %v112_v54, 0.0 }
 0x11d   :  { %331 = vmatprep.mubr.f32.mxu1 %v120_v55 }
 0x11e   :  { %332 = vmatmul.mubr.f32.vlgmr.msra.gmra.mrb[0].mxu1 %v121_v56 }
 0x1f1   :  { %v333_v58 = vpop.f32.mrb[0].mxu1 }
 0x1f2   :  { %v217_v59 = vadd.f32 %v333_v58, %v227_v57  ;;  %v211_v60 = vpop.f32.mrb[1].mxu1 }
 0x1f3   :  { %v212_v61 = vadd.f32 %v227_v57, %v211_v60 }
 0x1f4   :  { %221 = vst [vmem:[%s547_s5 + $0x8] sm:$0xff] %v217_v59 }
 0x1f5   :  { %220 = vst [vmem:[%s547_s5] sm:$0xff] %v212_v61 }

</bundles_post_ra>
